<compile_context>
chip_gen: v6e
topology: v6e:2x2x1
jax: 0.10.0
libtpu: 0.0.40
codegen_flags: <defaults>
</compile_context>

<pallas_src>
import math
from functools import partial

import jax
import jax.numpy as jnp
from jax.experimental import pallas as pl
from jax.experimental.pallas import tpu as pltpu


# ------------------------------ tiling helpers ------------------------------ #

_ROW_TILE_F32_BUDGET = 1 << 20   # ~1 MiB of f32 working data per input tile.
# With double-buffered input+output and the in-kernel f32 temporaries this stays
# comfortably under the 16 MiB scoped-VMEM default on v5e (and far under the
# 32 MiB defaults on v6e / v7x, 64 MiB physical on v7x).


def _row_tiling(o, n):
    """Pick a row tile (multiple of 8) and the padded row count."""
    o8 = ((o + 7) // 8) * 8
    rows = _ROW_TILE_F32_BUDGET // max(1, n * 4)
    rows = max(8, (rows // 8) * 8)
    to = min(rows, o8)
    o_pad = ((o + to - 1) // to) * to
    return to, o_pad


def _pad_rows(a, o_pad, value=0.0):
    o = a.shape[0]
    if o == o_pad:
        return a
    return jnp.pad(a, ((0, o_pad - o), (0, 0)), constant_values=value)


# ----------------------------- Pallas kernels ------------------------------ #

def _fused_observe_quant_pc_kernel(x_ref, s_ref, o_ref, *, factor, qn, qp):
    """Per-channel observer + fake-quantize, fused on one (TO, N) row block."""
    x = x_ref[...].astype(jnp.float32)                      # (TO, N)
    n = x.shape[1]
    mean = jnp.sum(x, axis=1, keepdims=True) * (1.0 / n)    # (TO, 1)
    centered = x - mean
    # centered (two-pass) unbiased variance matches torch.std numerics; the
    # extra full-block VPU pass is free under the mem-bound roofline.
    var = jnp.sum(centered * centered, axis=1, keepdims=True) * (1.0 / max(n - 1, 1))
    std = jnp.sqrt(var)
    stat = jnp.maximum(jnp.abs(mean - 3.0 * std), jnp.abs(mean + 3.0 * std))
    s = stat * factor                                       # new per-channel scale
    s_ref[...] = s
    inv_s = 1.0 / jnp.maximum(s, 1e-12)                     # per-row reciprocal (eps guard)
    q = jnp.round(jnp.clip(x * inv_s, qn, qp))
    o_ref[...] = (q * s).astype(o_ref.dtype)


def _quantize_kernel(x_ref, s_ref, o_ref, *, qn, qp):
    """Fake-quantize one (TO, N) block with a (TO,1) or (1,1) scale."""
    x = x_ref[...].astype(jnp.float32)
    s = s_ref[...].astype(jnp.float32)
    inv_s = 1.0 / jnp.maximum(s, 1e-12)
    q = jnp.round(jnp.clip(x * inv_s, qn, qp))
    o_ref[...] = (q * s).astype(o_ref.dtype)


def _per_tensor_sums_kernel(x_ref, sum_ref, sq_ref):
    """Gridded sum / sum-of-squares reduction (accumulated in the outputs)."""
    @pl.when(pl.program_id(0) == 0)
    def _():
        sum_ref[...] = jnp.zeros_like(sum_ref)
        sq_ref[...] = jnp.zeros_like(sq_ref)

    x = x_ref[...].astype(jnp.float32)
    sum_ref[...] = sum_ref[...] + jnp.sum(x).reshape(1, 1)
    sq_ref[...] = sq_ref[...] + jnp.sum(x * x).reshape(1, 1)


# ------------------------------ JAX wrappers -------------------------------- #

def observe_and_quantize_per_channel(x2d, factor, qn, qp):
    """Fused per-channel observer + fake-quant; returns ((O,1) scale, (O,N) x_q)."""
    o, n = x2d.shape
    to, o_pad = _row_tiling(o, n)
    xp = _pad_rows(x2d, o_pad)                      # padded zero rows are discarded
    scale, xq = pl.pallas_call(
        partial(_fused_observe_quant_pc_kernel,
                factor=float(factor), qn=float(qn), qp=float(qp)),
        out_shape=(jax.ShapeDtypeStruct((o_pad, 1), jnp.float32),
                   jax.ShapeDtypeStruct((o_pad, n), x2d.dtype)),
        grid=(o_pad // to,),
        in_specs=[pl.BlockSpec((to, n), lambda i: (i, 0))],
        out_specs=(pl.BlockSpec((to, 1), lambda i: (i, 0)),
                   pl.BlockSpec((to, n), lambda i: (i, 0))),
        compiler_params=pltpu.CompilerParams(dimension_semantics=("parallel",)),
    )(xp)
    return scale[:o], xq[:o]


def per_tensor_sums(x2d):
    """Tiled whole-tensor (sum, sum(x^2)) as two (1,1) f32 scalars."""
    o, n = x2d.shape
    to, o_pad = _row_tiling(o, n)
    xp = _pad_rows(x2d, o_pad)                      # zero padding leaves sums intact
    return pl.pallas_call(
        _per_tensor_sums_kernel,
        out_shape=(jax.ShapeDtypeStruct((1, 1), jnp.float32),
                   jax.ShapeDtypeStruct((1, 1), jnp.float32)),
        grid=(o_pad // to,),
        in_specs=[pl.BlockSpec((to, n), lambda i: (i, 0))],
        out_specs=(pl.BlockSpec((1, 1), lambda i: (0, 0)),
                   pl.BlockSpec((1, 1), lambda i: (0, 0))),
        compiler_params=pltpu.CompilerParams(dimension_semantics=("arbitrary",)),
    )(xp)


def fake_quantize(x2d, scale2d, qn, qp):
    """Tiled fake-quantization with a per-channel (O,1) or per-tensor (1,1) scale."""
    o, n = x2d.shape
    to, o_pad = _row_tiling(o, n)
    xp = _pad_rows(x2d, o_pad)
    scale2d = scale2d.astype(jnp.float32).reshape(scale2d.shape[0], 1)
    if scale2d.shape[0] == o:
        sp = _pad_rows(scale2d, o_pad, value=1.0)
        s_spec = pl.BlockSpec((to, 1), lambda i: (i, 0))     # per-channel scale
    else:
        sp = scale2d.reshape(1, 1)
        s_spec = pl.BlockSpec((1, 1), lambda i: (0, 0))      # per-tensor scale
    out = pl.pallas_call(
        partial(_quantize_kernel, qn=float(qn), qp=float(qp)),
        out_shape=jax.ShapeDtypeStruct((o_pad, n), x2d.dtype),
        grid=(o_pad // to,),
        in_specs=[pl.BlockSpec((to, n), lambda i: (i, 0)), s_spec],
        out_specs=pl.BlockSpec((to, n), lambda i: (i, 0)),
        compiler_params=pltpu.CompilerParams(dimension_semantics=("parallel",)),
    )(xp, sp)
    return out[:o]


# -------------------------------- module ------------------------------------ #

class LSQPlusWeightQuantizer:
    """JAX/Pallas port of the PyTorch LSQPlusWeightQuantizer forward pass."""

    def __init__(self, bits, qtype='qint', per_channel=False, quant=False,
                 observer=False, learning=False):
        assert bits != 1, "LSQ don't support binary quantization"
        assert qtype in ('qint', 'quint'), 'qtype just support qint or quint'
        self.bits = bits
        self.qtype = qtype
        self.quant = quant
        self.observer = observer
        self.learning = learning
        if qtype == 'quint':
            self.Qn = 0
            self.Qp = 2 ** bits - 1
        else:
            self.Qn = -2 ** (bits - 1)
            self.Qp = 2 ** (bits - 1) - 1
        self.per_channel = per_channel
        # torch.nn.Parameter(torch.ones(1)) -- deterministic init.
        self.scale = jnp.ones((1, 1), jnp.float32)
        self.grad_factor = 1.0
        self.observer_init = 1
        self.div = 2 ** bits - 1
        # TODO(synk): LSQ straight-through backward (WLSQPlus gradient / grad_factor
        # scaling) is autograd machinery and is not part of this forward kernel.

    def __call__(self, x):
        if not self.quant:
            return x
        self.grad_factor = 1.0 / math.sqrt(x.size * self.Qp)

        o = x.shape[0]
        x2d = x.reshape(o, -1)                       # native dtype; cast happens in-kernel
        n_total = x2d.shape[0] * x2d.shape[1]

        if self.observer:
            if self.per_channel:
                # First call: scale = stat / div.  Later calls (reference overwrites
                # the old scale with stat before the EMA): scale = stat*(0.9 + 0.1/div).
                factor = (1.0 / self.div) if self.observer_init == 1 else (0.9 + 0.1 / self.div)
                scale, xq2d = observe_and_quantize_per_channel(x2d, factor, self.Qn, self.Qp)
                self.scale = scale
                self.observer_init = 0
                return xq2d.reshape(x.shape)         # observer + quant fused: one HBM pass

            # Per-tensor: gridded sum / sum-of-squares reduction; scalar math in JAX.
            s_, sq_ = per_tensor_sums(x2d)
            mean = s_ / n_total
            var = jnp.maximum(sq_ - n_total * mean * mean, 0.0) / max(n_total - 1, 1)
            std = jnp.sqrt(var)
            stat = jnp.maximum(jnp.abs(mean - 3.0 * std), jnp.abs(mean + 3.0 * std))
            if self.observer_init == 1:
                self.scale = stat / self.div
                self.observer_init = 0
            else:
                self.scale = self.scale * 0.9 + 0.1 * stat / self.div

        if self.observer or self.learning:
            scale2d = self.scale
            if scale2d.ndim != 2:
                scale2d = scale2d.reshape(-1, 1)
            xq2d = fake_quantize(x2d, scale2d, self.Qn, self.Qp)
            return xq2d.reshape(x.shape)
        return x


# ------------------------------ self-test ----------------------------------- #

def _reference_scale(x, bits, per_channel):
    """torch observer scale on the first call: max(|mean±3*std|) / (2^bits - 1)."""
    div = 2 ** bits - 1
    o = x.shape[0]
    x2 = x.reshape(o, -1).astype(jnp.float32)
    if per_channel:
        mean = x2.mean(axis=1)
        std = x2.std(axis=1, ddof=1)
        stat = jnp.maximum(jnp.abs(mean - 3.0 * std), jnp.abs(mean + 3.0 * std))
        return (stat / div)[:, None]
    mean = x2.mean()
    std = x2.std(ddof=1)
    stat = jnp.maximum(jnp.abs(mean - 3.0 * std), jnp.abs(mean + 3.0 * std))
    return (stat / div).reshape(1, 1)


def _check_fake_quant(wq, x, scale_kernel, scale_ref, qn, qp, name, lvl_tol=1e-3):
    assert wq.shape == x.shape, name
    assert wq.dtype == x.dtype, name
    o = x.shape[0]
    x2 = x.reshape(o, -1).astype(jnp.float32)
    wq2 = wq.reshape(o, -1).astype(jnp.float32)
    # 1) scale matches the torch formula to f32 tolerance
    assert scale_kernel.shape == scale_ref.shape, name
    assert bool(jnp.allclose(scale_kernel, scale_ref, rtol=1e-4, atol=1e-6)), name
    # 2) output is round(clamp(x/s, Qn, Qp)) * s (robust to f32 rounding of s):
    #    quantization levels are (near-)integers in [Qn, Qp], within half a step
    #    of the exact (unrounded) level.
    lev = wq2 / scale_ref
    lev_exact = jnp.clip(x2 / scale_ref, qn, qp)
    assert float(jnp.max(jnp.abs(lev - jnp.round(lev)))) < lvl_tol, name
    assert float(jnp.min(jnp.round(lev))) >= qn, name
    assert float(jnp.max(jnp.round(lev))) <= qp, name
    assert float(jnp.max(jnp.abs(lev - lev_exact))) < 0.5 + lvl_tol, name


if __name__ == "__main__":
    key = jax.random.PRNGKey(0)
    k1, k2 = jax.random.split(key)

    # Conv weights in OIHW layout.
    w = jax.random.normal(k1, (8, 4, 3, 3), dtype=jnp.float32)        # O multiple of 8
    w_odd = jax.random.normal(k2, (20, 16, 3, 3), dtype=jnp.float32)  # O not a multiple of 8

    # --- per-channel observer quantization (fused kernel) --------------------
    q_pc = LSQPlusWeightQuantizer(bits=4, qtype='qint', per_channel=True,
                                  quant=True, observer=True)
    wq_pc = q_pc(w)
    jax.block_until_ready(wq_pc)
    s_ref_pc = _reference_scale(w, 4, True)
    _check_fake_quant(wq_pc, w, q_pc.scale, s_ref_pc, -8, 7, "per_channel_f32")

    # Second call exercises the EMA branch: scale = stat * (0.9 + 0.1/div).
    wq_pc2 = q_pc(w)
    jax.block_until_ready(wq_pc2)
    s_ref_pc2 = s_ref_pc * (0.9 * q_pc.div + 0.1)
    _check_fake_quant(wq_pc2, w, q_pc.scale, s_ref_pc2, -8, 7, "per_channel_f32_ema")

    # --- per-channel with O not divisible by 8 (padding / cdiv path) ---------
    q_odd = LSQPlusWeightQuantizer(bits=4, qtype='qint', per_channel=True,
                                   quant=True, observer=True)
    wq_odd = q_odd(w_odd)
    jax.block_until_ready(wq_odd)
    _check_fake_quant(wq_odd, w_odd, q_odd.scale, _reference_scale(w_odd, 4, True),
                      -8, 7, "per_channel_pad")

    # --- per-tensor observer quantization (gridded reduction + quantize) -----
    q_pt = LSQPlusWeightQuantizer(bits=4, qtype='qint', per_channel=False,
                                  quant=True, observer=True)
    wq_pt = q_pt(w)
    jax.block_until_ready(wq_pt)
    s_ref_pt = _reference_scale(w, 4, False)
    _check_fake_quant(wq_pt, w, q_pt.scale, s_ref_pt, -8, 7, "per_tensor_f32")

    # Per-tensor EMA with the same input keeps the same scale.
    wq_pt2 = q_pt(w)
    jax.block_until_ready(wq_pt2)
    _check_fake_quant(wq_pt2, w, q_pt.scale, s_ref_pt, -8, 7, "per_tensor_f32_ema")

    # --- dtype preservation: bf16 weights stay bf16 ---------------------------
    w_bf16 = w.astype(jnp.bfloat16)
    q_bf = LSQPlusWeightQuantizer(bits=4, qtype='qint', per_channel=True,
                                  quant=True, observer=True)
    wq_bf = q_bf(w_bf16)
    jax.block_until_ready(wq_bf)
    _check_fake_quant(wq_bf, w_bf16, q_bf.scale, _reference_scale(w_bf16, 4, True),
                      -8, 7, "per_channel_bf16", lvl_tol=0.05)

    # --- unsigned (quint) range -----------------------------------------------
    q_u = LSQPlusWeightQuantizer(bits=8, qtype='quint', per_channel=True,
                                 quant=True, observer=True)
    wq_u = q_u(w)
    jax.block_until_ready(wq_u)
    _check_fake_quant(wq_u, w, q_u.scale, _reference_scale(w, 8, True),
                      0, 255, "per_channel_quint8")

    # --- learning-only path (scale parameter stays at its init value 1.0) ----
    q_learn = LSQPlusWeightQuantizer(bits=4, qtype='qint', per_channel=False,
                                     quant=True, observer=False, learning=True)
    wq_l = q_learn(w)
    jax.block_until_ready(wq_l)
    assert bool(jnp.allclose(wq_l, jnp.round(jnp.clip(w, -8, 7)), atol=1e-6))

    # --- quant=False is the identity ------------------------------------------
    q_off = LSQPlusWeightQuantizer(bits=4, quant=False)
    assert bool(jnp.array_equal(q_off(w), w))

    print("KERNEL_OK")
</pallas_src>

<mosaic_0001>
module attributes {stable_mosaic.version = 11 : i64} {
  func.func @_fused_observe_quant_pc_kernel(%arg0: i32, %arg1: memref<8x36xf32, #tpu.memory_space<vmem>>, %arg2: memref<8x1xf32, #tpu.memory_space<vmem>>, %arg3: memref<8x36xf32, #tpu.memory_space<vmem>>) attributes {dimension_semantics = [#tpu.dimension_semantics<parallel>], iteration_bounds = array<i64: 1>, scalar_prefetch = 0 : i64, scratch_operands = 0 : i64, tpu.core_type = #tpu.core_type<tc>, window_params = [{transform_indices = @transform_0, window_bounds = array<i64: 8, 36>}, {transform_indices = @transform_1, window_bounds = array<i64: 8, 1>}, {transform_indices = @transform_2, window_bounds = array<i64: 8, 36>}]} {
    %c0 = arith.constant 0 : index
    %c0_0 = arith.constant 0 : index
    %0 = vector.load %arg1[%c0, %c0_0] : memref<8x36xf32, #tpu.memory_space<vmem>>, vector<8x36xf32>
    %cst = arith.constant dense<0.000000e+00> : vector<8xf32>
    %1 = vector.multi_reduction <add>, %0, %cst [1] : vector<8x36xf32> to vector<8xf32>
    %2 = vector.shape_cast %1 : vector<8xf32> to vector<8x1xf32>
    %cst_1 = arith.constant 0.027777778 : f32
    %3 = vector.broadcast %cst_1 : f32 to vector<8x1xf32>
    %4 = arith.mulf %2, %3 : vector<8x1xf32>
    %5 = vector.broadcast %4 : vector<8x1xf32> to vector<8x36xf32>
    %6 = arith.subf %0, %5 : vector<8x36xf32>
    %7 = arith.mulf %6, %6 : vector<8x36xf32>
    %cst_2 = arith.constant dense<0.000000e+00> : vector<8xf32>
    %8 = vector.multi_reduction <add>, %7, %cst_2 [1] : vector<8x36xf32> to vector<8xf32>
    %9 = vector.shape_cast %8 : vector<8xf32> to vector<8x1xf32>
    %cst_3 = arith.constant 0.0285714287 : f32
    %10 = vector.broadcast %cst_3 : f32 to vector<8x1xf32>
    %11 = arith.mulf %9, %10 : vector<8x1xf32>
    %12 = math.sqrt %11 : vector<8x1xf32>
    %cst_4 = arith.constant 3.000000e+00 : f32
    %13 = vector.broadcast %cst_4 : f32 to vector<8x1xf32>
    %14 = arith.mulf %13, %12 : vector<8x1xf32>
    %15 = arith.subf %4, %14 : vector<8x1xf32>
    %16 = math.absf %15 : vector<8x1xf32>
    %cst_5 = arith.constant 3.000000e+00 : f32
    %17 = vector.broadcast %cst_5 : f32 to vector<8x1xf32>
    %18 = arith.mulf %17, %12 : vector<8x1xf32>
    %19 = arith.addf %4, %18 : vector<8x1xf32>
    %20 = math.absf %19 : vector<8x1xf32>
    %21 = arith.maximumf %16, %20 : vector<8x1xf32>
    %cst_6 = arith.constant 0.0666666701 : f32
    %22 = vector.broadcast %cst_6 : f32 to vector<8x1xf32>
    %23 = arith.mulf %21, %22 : vector<8x1xf32>
    %c0_7 = arith.constant 0 : index
    %c0_8 = arith.constant 0 : index
    %24 = vector.load %arg2[%c0_7, %c0_8] : memref<8x1xf32, #tpu.memory_space<vmem>>, vector<8x1xf32>
    tpu.vector_store %arg2[%c0_7, %c0_8], %23 {strides = array<i32>} : memref<8x1xf32, #tpu.memory_space<vmem>>, vector<8x1xf32>,
    %cst_9 = arith.constant 9.99999996E-13 : f32
    %25 = vector.broadcast %cst_9 : f32 to vector<8x1xf32>
    %26 = arith.maximumf %23, %25 : vector<8x1xf32>
    %cst_10 = arith.constant 1.000000e+00 : f32
    %27 = vector.broadcast %cst_10 : f32 to vector<8x1xf32>
    %28 = arith.divf %27, %26 : vector<8x1xf32>
    %29 = vector.broadcast %28 : vector<8x1xf32> to vector<8x36xf32>
    %30 = arith.mulf %0, %29 : vector<8x36xf32>
    %cst_11 = arith.constant -8.000000e+00 : f32
    %cst_12 = arith.constant 7.000000e+00 : f32
    %31 = vector.broadcast %cst_11 : f32 to vector<8x36xf32>
    %32 = arith.maximumf %31, %30 : vector<8x36xf32>
    %33 = vector.broadcast %cst_12 : f32 to vector<8x36xf32>
    %34 = arith.minimumf %33, %32 : vector<8x36xf32>
    %35 = math.roundeven %34 : vector<8x36xf32>
    %36 = vector.broadcast %23 : vector<8x1xf32> to vector<8x36xf32>
    %37 = arith.mulf %35, %36 : vector<8x36xf32>
    %c0_13 = arith.constant 0 : index
    %c0_14 = arith.constant 0 : index
    %38 = vector.load %arg3[%c0_13, %c0_14] : memref<8x36xf32, #tpu.memory_space<vmem>>, vector<8x36xf32>
    tpu.vector_store %arg3[%c0_13, %c0_14], %37 {strides = array<i32>} : memref<8x36xf32, #tpu.memory_space<vmem>>, vector<8x36xf32>,
    return
  }
  func.func @transform_0(%arg0: i32) -> (i32, i32) {
    %c0_i32 = arith.constant 0 : i32
    %c0_i32_0 = arith.constant 0 : i32
    return %arg0, %c0_i32 : i32, i32
  }
  func.func @transform_1(%arg0: i32) -> (i32, i32) {
    %c0_i32 = arith.constant 0 : i32
    %c0_i32_0 = arith.constant 0 : i32
    return %arg0, %c0_i32 : i32, i32
  }
  func.func @transform_2(%arg0: i32) -> (i32, i32) {
    %c0_i32 = arith.constant 0 : i32
    %c0_i32_0 = arith.constant 0 : i32
    return %arg0, %c0_i32 : i32, i32
  }
}

</mosaic_0001>

<bundles_post_ra>
// kernel: tpu_custom_call.1
= control target key start
LH: loop header
LB: loop body
LE: loop exit
PB: predicated region body
PF: predicated region fallthrough
CT: control target
= control target key end

     0   :  { %8 = vsyncpa [#allocation3], 0  ;;  %s166_s0 = inlined_call_operand.hbm [shape: f32[8,36], index: 0, kind: input, shape index: {}]   ;;  %s167_s1 = inlined_call_operand.vmem [shape: f32[8,1], index: 1, kind: output, shape index: {0}]   ;;  %s168_s2 = inlined_call_operand.hbm [shape: f32[8,36], index: 2, kind: output, shape index: {1}]  }
   0x1   :  { %9 = vsyncpa [#allocation4], 0  ;;  %s137_s9 = smov [#allocation2]  }
   0x2   :  { %s16_s10 = sshll.u32 %s137_s9, 4  ;;  %s17_s10 = int_to_ptr.vmem [resolvable:$true] %s16_s10 }
   0x3   :  { %s101_s11 = scalar_lea.vmem %s17_s10, 128  ;;  %p106_p1 = scmp.lt.s32.totalorder %s17_s10, %s17_s10 }
   0x4   :  { %p102_p0 = scmp.ne.s32.totalorder %s17_s10, %s101_s11  ;;  %p107_p2 = scmp.lt.s32.totalorder %s101_s11, %s101_s11 }
   0x6   :  { %p108_p3 = por %p107_p2, %p106_p1 }
   0x8   :  { %p109_p4 = pnand %p108_p3, %p102_p0 }
   0xa   :  { %112 = shalt.err (!%p109_p4)
}
   0xb   :  { %19 = dma.hbm_to_vmem [thread:$0]  %s166_s0, 128, %s17_s10, [#allocation3]  }
   0xc   :  { %133 = dma.done.wait [#allocation3], 128  }
   0xd   :  { %134 = vsyncadd [#allocation3], 4294967168  ;;  %vm24_vm0 = vcmask 293888   ;;  %v23_v0 = vld [vmem:[#allocation2] sm:$0xff]  ;;  %vm49_vm3 = vcmask 7168   ;;  %s138_s15 = smov [#allocation5]  }
   0xe   :  { %v25_v1 = vsel %vm24_vm0, %v23_v0, 0.0  ;;  %s68_s16 = sshll.u32 %s138_s15, 4  ;;  %s69_s16 = int_to_ptr.vmem [resolvable:$true] %s68_s16 }
   0xf   :  { %26 = vadd.xlane.f32.xlu0 %v25_v1  ;;  %p118_p6 = scmp.lt.s32.totalorder %s69_s16, %s69_s16 }
  0x98   :  { %v27_v2 = vpop.xlane.xlu0 %26 }
  0x99   :  { %v28_v3 = vmul.f32 0.027777778, %v27_v2 }
  0x9b   :  { %v29_v4 = vsub.f32 %v23_v0, %v28_v3 }
  0x9d   :  { %v30_v5 = vmul.f32 %v29_v4, %v29_v4 }
  0x9f   :  { %v31_v6 = vsel %vm24_vm0, %v30_v5, 0.0 }
  0xa0   :  { %32 = vadd.xlane.f32.xlu0 %v31_v6 }
 0x129   :  { %v33_v7 = vpop.xlane.xlu0 %32 }
 0x12a   :  { %v34_v8 = vmul.f32 0.028571429, %v33_v7 }
 0x12c   :  { %89 = vrsqrt.f32 %v34_v8  ;;  %vm37_vm1 = vcmp.eq.f32.partialorder %v34_v8, inf  ;;  %v40_v11 = vand.u32 2147483648, %v34_v8  ;;  %vm39_vm2 = vcmp.eq.f32.partialorder %v34_v8, 0.0 }
 0x139   :  { %v90_v9 = vpop.eup %89 }
 0x13a   :  { %v36_v10 = vmul.f32 %v90_v9, %v34_v8 }
 0x13c   :  { %v38_v12 = vsel %vm37_vm1, %v34_v8, %v36_v10 }
 0x13d   :  { %v41_v13 = vsel %vm39_vm2, %v40_v11, %v38_v12 }
 0x13e   :  { %v42_v14 = vmul.f32 3.0, %v41_v13 }
 0x140   :  { %v43_v15 = vsub.f32 %v28_v3, %v42_v14  ;;  %v45_v16 = vadd.f32 %v42_v14, %v28_v3 }
 0x142   :  { %v44_v17 = vand.u32 2147483647, %v43_v15  ;;  %v46_v18 = vand.u32 2147483647, %v45_v16 }
 0x144   :  { %v47_v19 = vmax.f32.f32 %v44_v17, %v46_v18 }
 0x146   :  { %v48_v20 = vmul.f32 0.06666667, %v47_v19 }
 0x148   :  { %50 = vst.msk [vmem:[%s167_s1] sm:$0xff] %vm49_vm3, %v48_v20  ;;  %v51_v21 = vmax.f32 %v48_v20, 1e-12  ;;  %s113_s1 = scalar_lea.vmem %s69_s16, 128 }
 0x149   :  { %p114_p5 = scmp.ne.s32.totalorder %s69_s16, %s113_s1  ;;  %p119_p7 = scmp.lt.s32.totalorder %s113_s1, %s113_s1 }
 0x14a   :  { %91 = vrcp.f32 %v51_v21 }
 0x14b   :  { %p120_p8 = por %p119_p7, %p118_p6 }
 0x14d   :  { %p121_p9 = pnand %p120_p8, %p114_p5 }
 0x157   :  { %v92_v22 = vpop.eup %91 }
 0x158   :  { %v54_v23 = vmul.f32 %v92_v22, %v23_v0 }
 0x15a   :  { %v55_v24 = vmax.f32 %v54_v23, -8.0 }
 0x15c   :  { %v56_v25 = vmin.f32 %v55_v24, 7.0 }
 0x15e   :  { %v81_v26 = vcvt.f32.s32 %v56_v25  ;;  %v79_v28 = vand.u32 2147483647, %v56_v25  ;;  %v84_v30 = vand.u32 2147483648, %v56_v25 }
 0x160   :  { %v82_v27 = vcvt.s32.f32 %v81_v26  ;;  %vm80_vm4 = vcmp.lt.f32.partialorder %v79_v28, 8388608.0 }
 0x162   :  { %v83_v29 = vand.u32 2147483647, %v82_v27 }
 0x164   :  { %v85_v31 = vor.u32 %v84_v30, %v83_v29 }
 0x166   :  { %v86_v32 = vsel %vm80_vm4, %v85_v31, %v56_v25 }
 0x167   :  { %v58_v33 = vmul.f32 %v86_v32, %v48_v20 }
 0x169   :  { %59 = vst.msk [vmem:[#allocation5] sm:$0xff] %vm24_vm0, %v58_v33 }
 0x16a   :  { %124 = shalt.err (!%p121_p9)
}
 0x16b   :  { %71 = dma.vmem_to_hbm [thread:$0]  %s69_s16, 128, %s168_s2, [#allocation4]  }
 0x16c   :  { %135 = dma.done.wait [#allocation4], 128  }
 0x16d   :  { %136 = vsyncadd [#allocation4], 4294967168 }
 0x16e   :  { %77 = vsyncpa [#allocation3], 1 }
 0x16f   :  { %78 = vsyncpa [#allocation4], 1 }

</bundles_post_ra>
